<compile_context>
chip_gen: v5e
topology: v5e:2x2
jax: 0.10.0
libtpu: 0.0.40
codegen_flags: <defaults>
</compile_context>

<pallas_src>
import functools

import jax
import jax.numpy as jnp
from jax.experimental import pallas as pl
from jax.experimental.pallas import tpu as pltpu

_LANES = 128      # lane width: pad feature dims to multiples of this
_SUBLANES = 16    # sublane multiple for batch tiles (valid for bf16 and f32)


def _round_up(n, m):
    return ((n + m - 1) // m) * m


def _fused_mlp_kernel(x_ref, *refs, num_layers):
    """Fused MLP body. refs = (w_0, b_0, ..., w_{L-1}, b_{L-1}, o_ref).

    Weights arrive pre-transposed as bf16 [IN_pad, OUT_pad]; the layer loop is
    statically unrolled (few layers), so intermediates never touch HBM.
    """
    o_ref = refs[-1]
    h = x_ref[...]                       # [TILE_B, IN_pad] f32
    for i in range(num_layers):
        w = refs[2 * i][...]             # [IN_pad, OUT_pad] bf16
        b = refs[2 * i + 1][...]         # [1, OUT_pad]      f32 (single row)
        # bf16 operands feed the MXU at full rate on all gens; accumulate in
        # f32, then do bias-add/ReLU in f32 on the VPU (v5e has no bf16 VPU).
        h = jnp.dot(h.astype(jnp.bfloat16), w,
                    preferred_element_type=jnp.float32) + b
        if i < num_layers - 1:
            h = jnp.maximum(h, 0.0)
    # TODO(synk): for deep stacks, bounce h through a reusable VMEM scratch to
    # bound live ranges; unnecessary at this depth.
    o_ref[...] = h.astype(o_ref.dtype)


def init_dense_params(key, input_dim: int, layers_sizes):
    """Mirrors the PyTorch module: weight ~ xavier_normal_, bias ~ PyTorch
    Linear default U(-1/sqrt(fan_in), 1/sqrt(fan_in)). PyTorch layout
    (w: [OUT, IN], b: [OUT]); kernel layout is built in prepare_dense_params().
    """
    params = []
    fan_in = input_dim
    for out_dim in layers_sizes:
        key, kw, kb = jax.random.split(key, 3)
        std = (2.0 / (fan_in + out_dim)) ** 0.5
        w = std * jax.random.normal(kw, (out_dim, fan_in), dtype=jnp.float32)
        bound = 1.0 / (fan_in ** 0.5)
        b = jax.random.uniform(
            kb, (out_dim,), minval=-bound, maxval=bound, dtype=jnp.float32
        )
        params.append((w, b))
        fan_in = out_dim
    return params


def prepare_dense_params(params):
    """One-time layout plumbing: transpose to [IN, OUT], zero-pad both feature
    dims to 128-lane multiples, and cast weights to bf16 (MXU-native, half the
    DMA bytes). Biases stay f32. Padded rows/cols are exactly zero, so padded
    lanes carry exact zeros through dot+ReLU and never leak into valid outputs.
    """
    prepared = []
    for w, b in params:
        out_dim, in_dim = w.shape
        in_p = _round_up(in_dim, _LANES)
        out_p = _round_up(out_dim, _LANES)
        w_t = (jnp.zeros((in_p, out_p), jnp.float32)
               .at[:in_dim, :out_dim].set(w.T)
               .astype(jnp.bfloat16))
        b_p = jnp.zeros((1, out_p), jnp.float32).at[:, :out_dim].set(b[None, :])
        prepared.append((w_t, b_p))
    return prepared


def fused_dense_forward(x, prepared, true_out_dim, *, batch_tile=256):
    """Run the whole MLP in a single pallas_call. x: [B, IN] f32."""
    B, IN = x.shape
    in_pad = prepared[0][0].shape[0]
    out_pad = prepared[-1][0].shape[1]
    num_layers = len(prepared)

    b_sub = _round_up(B, _SUBLANES)
    tile_b = min(b_sub, batch_tile)
    # v7x has 2 TensorCores: the "parallel" batch axis only shards if the grid
    # has >= 2 steps. Cap tile_b at half the batch when that costs no extra
    # padding (no-op for the tiny toy batch -> grid=(1,)).
    half = (b_sub // 2) // _SUBLANES * _SUBLANES
    if half >= _SUBLANES:
        tile_b = min(tile_b, half)
    b_pad = _round_up(b_sub, tile_b)

    # Zero-pad activations once in the wrapper (padded rows/cols are inert;
    # padded batch rows only pick up the bias and are sliced off below).
    x_p = jnp.zeros((b_pad, in_pad), x.dtype).at[:B, :IN].set(x)

    flat_wb = [a for wb in prepared for a in wb]

    in_specs = [pl.BlockSpec((tile_b, in_pad), lambda i: (i, 0))]
    for w_t, b_p in prepared:
        # Constant index_map -> the block never changes across grid steps;
        # single-buffer to halve weight VMEM residency.
        in_specs.append(pl.BlockSpec(w_t.shape, lambda i: (0, 0),
                                     pipeline_mode=pl.Buffered(1)))
        in_specs.append(pl.BlockSpec(b_p.shape, lambda i: (0, 0),
                                     pipeline_mode=pl.Buffered(1)))

    # --- VMEM budget: single-buffered weights/biases + double-buffered x/out
    #     tiles + chained per-layer intermediates. Must fit v7x (64 MiB/TC). ---
    wb_bytes = sum(int(a.size) * a.dtype.itemsize for a in flat_wb)
    max_out = max(int(w.shape[1]) for w, _ in prepared)
    act_bytes = 2 * tile_b * in_pad * 4 + 2 * tile_b * out_pad * 4
    inter_bytes = 2 * tile_b * max_out * 4
    needed = wb_bytes + act_bytes + inter_bytes
    assert needed <= (56 << 20), (
        "fused weight stack would not fit v7x VMEM; shrink batch_tile or add "
        "an inner weight-column pipeline")
    # TODO(synk): for very wide real layers, pipeline weight N-blocks with
    # pltpu.emit_pipeline instead of keeping every full weight resident.
    vmem_limit = int(min(max(2 * needed, 32 << 20), 64 << 20))

    flops = 2 * b_pad * sum(int(w.shape[0]) * int(w.shape[1])
                            for w, _ in prepared)
    bytes_accessed = (int(x_p.size) * x_p.dtype.itemsize + wb_bytes
                      + b_pad * out_pad * x.dtype.itemsize)

    kernel = functools.partial(_fused_mlp_kernel, num_layers=num_layers)

    out = pl.pallas_call(
        kernel,
        out_shape=jax.ShapeDtypeStruct((b_pad, out_pad), x.dtype),
        grid=(b_pad // tile_b,),
        in_specs=in_specs,
        out_specs=pl.BlockSpec((tile_b, out_pad), lambda i: (i, 0)),
        compiler_params=pltpu.CompilerParams(
            dimension_semantics=("parallel",),   # shards batch across TCs (v7x)
            vmem_limit_bytes=vmem_limit,
        ),
        cost_estimate=pl.CostEstimate(
            flops=flops, transcendentals=0, bytes_accessed=bytes_accessed),
    )(x_p, *flat_wb)

    # Slice padded batch rows / padded output lanes back to the true shape.
    return out[:B, :true_out_dim]


if __name__ == "__main__":
    key = jax.random.PRNGKey(0)
    key, kx = jax.random.split(key)

    batch = 8
    input_dim = 32
    layers_sizes = [64, 48, 16]

    x = jax.random.normal(kx, (batch, input_dim), dtype=jnp.float32)
    params = init_dense_params(key, input_dim, layers_sizes)
    prepared = prepare_dense_params(params)

    out = fused_dense_forward(x, prepared, layers_sizes[-1])
    out = jax.block_until_ready(out)

    # Reference check in plain JAX / f32 (same math as the PyTorch module).
    # Tolerance is loosened because the kernel runs the matmuls with bf16
    # operands (f32 accumulation) for MXU throughput.
    ref = x
    for w, b in params[:-1]:
        ref = jnp.maximum(ref @ w.T + b, 0.0)
    w, b = params[-1]
    ref = ref @ w.T + b

    assert out.shape == (batch, layers_sizes[-1])
    assert jnp.allclose(out, ref, atol=8e-2, rtol=8e-2), (
        float(jnp.max(jnp.abs(out - ref))))

    print("KERNEL_OK")
</pallas_src>

<mosaic_0001>
module attributes {stable_mosaic.version = 11 : i64} {
  func.func @_fused_mlp_kernel(%arg0: i32, %arg1: memref<16x128xf32, #tpu.memory_space<vmem>>, %arg2: memref<128x128xbf16, #tpu.memory_space<vmem>>, %arg3: memref<1x128xf32, #tpu.memory_space<vmem>>, %arg4: memref<128x128xbf16, #tpu.memory_space<vmem>>, %arg5: memref<1x128xf32, #tpu.memory_space<vmem>>, %arg6: memref<128x128xbf16, #tpu.memory_space<vmem>>, %arg7: memref<1x128xf32, #tpu.memory_space<vmem>>, %arg8: memref<16x128xf32, #tpu.memory_space<vmem>>) attributes {dimension_semantics = [#tpu.dimension_semantics<parallel>], iteration_bounds = array<i64: 1>, scalar_prefetch = 0 : i64, scratch_operands = 0 : i64, tpu.core_type = #tpu.core_type<tc>, window_params = [{transform_indices = @transform_0, window_bounds = array<i64: 16, 128>}, {pipeline_mode = #tpu.pipeline_mode<synchronous>, transform_indices = @transform_1, window_bounds = array<i64: 128, 128>}, {pipeline_mode = #tpu.pipeline_mode<synchronous>, transform_indices = @transform_2, window_bounds = array<i64: 1, 128>}, {pipeline_mode = #tpu.pipeline_mode<synchronous>, transform_indices = @transform_3, window_bounds = array<i64: 128, 128>}, {pipeline_mode = #tpu.pipeline_mode<synchronous>, transform_indices = @transform_4, window_bounds = array<i64: 1, 128>}, {pipeline_mode = #tpu.pipeline_mode<synchronous>, transform_indices = @transform_5, window_bounds = array<i64: 128, 128>}, {pipeline_mode = #tpu.pipeline_mode<synchronous>, transform_indices = @transform_6, window_bounds = array<i64: 1, 128>}, {transform_indices = @transform_7, window_bounds = array<i64: 16, 128>}]} {
    %c0 = arith.constant 0 : index
    %c0_0 = arith.constant 0 : index
    %0 = vector.load %arg1[%c0, %c0_0] : memref<16x128xf32, #tpu.memory_space<vmem>>, vector<16x128xf32>
    %c0_1 = arith.constant 0 : index
    %c0_2 = arith.constant 0 : index
    %1 = vector.load %arg2[%c0_1, %c0_2] : memref<128x128xbf16, #tpu.memory_space<vmem>>, vector<128x128xbf16>
    %c0_3 = arith.constant 0 : index
    %c0_4 = arith.constant 0 : index
    %2 = vector.load %arg3[%c0_3, %c0_4] : memref<1x128xf32, #tpu.memory_space<vmem>>, vector<1x128xf32>
    %3 = arith.truncf %0 : vector<16x128xf32> to vector<16x128xbf16>
    %cst = arith.constant dense<0.000000e+00> : vector<16x128xf32>
    %4 = tpu.matmul %3, %1, %cst {dimension_numbers = #tpu.dot_dimension_numbers<[1], [0], [0], [1], [0, 0, 1, 1], [], []>} : vector<16x128xbf16>, vector<128x128xbf16>, vector<16x128xf32> -> vector<16x128xf32>
    %5 = vector.broadcast %2 : vector<1x128xf32> to vector<16x128xf32>
    %6 = arith.addf %4, %5 : vector<16x128xf32>
    %cst_5 = arith.constant 0.000000e+00 : f32
    %7 = vector.broadcast %cst_5 : f32 to vector<16x128xf32>
    %8 = arith.maximumf %6, %7 : vector<16x128xf32>
    %c0_6 = arith.constant 0 : index
    %c0_7 = arith.constant 0 : index
    %9 = vector.load %arg4[%c0_6, %c0_7] : memref<128x128xbf16, #tpu.memory_space<vmem>>, vector<128x128xbf16>
    %c0_8 = arith.constant 0 : index
    %c0_9 = arith.constant 0 : index
    %10 = vector.load %arg5[%c0_8, %c0_9] : memref<1x128xf32, #tpu.memory_space<vmem>>, vector<1x128xf32>
    %11 = arith.truncf %8 : vector<16x128xf32> to vector<16x128xbf16>
    %cst_10 = arith.constant dense<0.000000e+00> : vector<16x128xf32>
    %12 = tpu.matmul %11, %9, %cst_10 {dimension_numbers = #tpu.dot_dimension_numbers<[1], [0], [0], [1], [0, 0, 1, 1], [], []>} : vector<16x128xbf16>, vector<128x128xbf16>, vector<16x128xf32> -> vector<16x128xf32>
    %13 = vector.broadcast %10 : vector<1x128xf32> to vector<16x128xf32>
    %14 = arith.addf %12, %13 : vector<16x128xf32>
    %cst_11 = arith.constant 0.000000e+00 : f32
    %15 = vector.broadcast %cst_11 : f32 to vector<16x128xf32>
    %16 = arith.maximumf %14, %15 : vector<16x128xf32>
    %c0_12 = arith.constant 0 : index
    %c0_13 = arith.constant 0 : index
    %17 = vector.load %arg6[%c0_12, %c0_13] : memref<128x128xbf16, #tpu.memory_space<vmem>>, vector<128x128xbf16>
    %c0_14 = arith.constant 0 : index
    %c0_15 = arith.constant 0 : index
    %18 = vector.load %arg7[%c0_14, %c0_15] : memref<1x128xf32, #tpu.memory_space<vmem>>, vector<1x128xf32>
    %19 = arith.truncf %16 : vector<16x128xf32> to vector<16x128xbf16>
    %cst_16 = arith.constant dense<0.000000e+00> : vector<16x128xf32>
    %20 = tpu.matmul %19, %17, %cst_16 {dimension_numbers = #tpu.dot_dimension_numbers<[1], [0], [0], [1], [0, 0, 1, 1], [], []>} : vector<16x128xbf16>, vector<128x128xbf16>, vector<16x128xf32> -> vector<16x128xf32>
    %21 = vector.broadcast %18 : vector<1x128xf32> to vector<16x128xf32>
    %22 = arith.addf %20, %21 : vector<16x128xf32>
    %c0_17 = arith.constant 0 : index
    %c0_18 = arith.constant 0 : index
    %23 = vector.load %arg8[%c0_17, %c0_18] : memref<16x128xf32, #tpu.memory_space<vmem>>, vector<16x128xf32>
    tpu.vector_store %arg8[%c0_17, %c0_18], %22 {strides = array<i32>} : memref<16x128xf32, #tpu.memory_space<vmem>>, vector<16x128xf32>,
    return
  }
  func.func @transform_0(%arg0: i32) -> (i32, i32) {
    %c0_i32 = arith.constant 0 : i32
    %c0_i32_0 = arith.constant 0 : i32
    return %arg0, %c0_i32 : i32, i32
  }
  func.func @transform_1(%arg0: i32) -> (i32, i32) {
    %c0_i32 = arith.constant 0 : i32
    %c0_i32_0 = arith.constant 0 : i32
    %c0_i32_1 = arith.constant 0 : i32
    return %c0_i32, %c0_i32_0 : i32, i32
  }
  func.func @transform_2(%arg0: i32) -> (i32, i32) {
    %c0_i32 = arith.constant 0 : i32
    %c0_i32_0 = arith.constant 0 : i32
    %c0_i32_1 = arith.constant 0 : i32
    return %c0_i32, %c0_i32_0 : i32, i32
  }
  func.func @transform_3(%arg0: i32) -> (i32, i32) {
    %c0_i32 = arith.constant 0 : i32
    %c0_i32_0 = arith.constant 0 : i32
    %c0_i32_1 = arith.constant 0 : i32
    return %c0_i32, %c0_i32_0 : i32, i32
  }
  func.func @transform_4(%arg0: i32) -> (i32, i32) {
    %c0_i32 = arith.constant 0 : i32
    %c0_i32_0 = arith.constant 0 : i32
    %c0_i32_1 = arith.constant 0 : i32
    return %c0_i32, %c0_i32_0 : i32, i32
  }
  func.func @transform_5(%arg0: i32) -> (i32, i32) {
    %c0_i32 = arith.constant 0 : i32
    %c0_i32_0 = arith.constant 0 : i32
    %c0_i32_1 = arith.constant 0 : i32
    return %c0_i32, %c0_i32_0 : i32, i32
  }
  func.func @transform_6(%arg0: i32) -> (i32, i32) {
    %c0_i32 = arith.constant 0 : i32
    %c0_i32_0 = arith.constant 0 : i32
    %c0_i32_1 = arith.constant 0 : i32
    return %c0_i32, %c0_i32_0 : i32, i32
  }
  func.func @transform_7(%arg0: i32) -> (i32, i32) {
    %c0_i32 = arith.constant 0 : i32
    %c0_i32_0 = arith.constant 0 : i32
    return %arg0, %c0_i32 : i32, i32
  }
}

</mosaic_0001>

<bundles_post_ra>
// kernel: tpu_custom_call.1
= control target key start
LH: loop header
LB: loop body
LE: loop exit
PB: predicated region body
PF: predicated region fallthrough
CT: control target
= control target key end

     0   :  { %12 = vsyncpa [#allocation3], 0  ;;  %s707_s0 = inlined_call_operand.hbm [shape: f32[16,128], index: 0, kind: input, shape index: {}]   ;;  %s708_s1 = inlined_call_operand.hbm [shape: bf16[128,128], index: 1, kind: input, shape index: {}]   ;;  %s709_s2 = inlined_call_operand.vmem [shape: f32[1,128], index: 2, kind: input, shape index: {}]   ;;  %s710_s3 = inlined_call_operand.hbm [shape: bf16[128,128], index: 3, kind: input, shape index: {}]   ;;  %s711_s4 = inlined_call_operand.vmem [shape: f32[1,128], index: 4, kind: input, shape index: {}]   ;;  %s712_s5 = inlined_call_operand.hbm [shape: bf16[128,128], index: 5, kind: input, shape index: {}]   ;;  %s713_s6 = inlined_call_operand.vmem [shape: f32[1,128], index: 6, kind: input, shape index: {}]   ;;  %s714_s7 = inlined_call_operand.hbm [shape: f32[16,128], index: 7, kind: output, shape index: {}]  }
   0x1   :  { %13 = vsyncpa [#allocation6], 0 }
   0x2   :  { %14 = vsyncpa [#allocation9], 0  ;;  %s33_s26 = sshll.u32 %s708_s1, 4  ;;  %s34_s26 = int_to_ptr.hbm [resolvable:$true] %s33_s26 }
   0x3   :  { %15 = vsyncpa [#allocation4], 0  ;;  %s628_s27 = smov [#allocation5]   ;;  %s20_s8 = sshll.u32 %s707_s0, 4  ;;  %s21_s8 = int_to_ptr.hbm [resolvable:$true] %s20_s8 }
   0x4   :  { %s35_s28 = sshll.u32 %s628_s27, 4  ;;  %s629_s9 = smov 64   ;;  %s36_s28 = int_to_ptr.vmem [resolvable:$true] %s35_s28 }
   0x5   :  { %s630_s10 = smov 4   ;;  %s631_s11 = smov [#allocation2]  }
   0x6   :  { %41 = dma.hbm_to_vmem [thread:$0]  %s34_s26, 1024, %s36_s28, [#allocation6], %s629_s9, %s629_s9, %s630_s10  }
   0x7   :  { %s22_s12 = sshll.u32 %s631_s11, 4  ;;  %s632_s13 = smov 128   ;;  %s23_s12 = int_to_ptr.vmem [resolvable:$true] %s22_s12 }
   0x8   :  { %s633_s14 = smov 8   ;;  %s48_s16 = sshll.u32 %s710_s3, 4  ;;  %s49_s16 = int_to_ptr.hbm [resolvable:$true] %s48_s16 }
   0x9   :  { %28 = dma.hbm_to_vmem [thread:$0]  %s21_s8, 256, %s23_s12, [#allocation3], %s632_s13, %s632_s13, %s633_s14  }
   0xa   :  { %s634_s17 = smov [#allocation7]   ;;  %s63_s20 = sshll.u32 %s712_s5, 4  ;;  %s64_s20 = int_to_ptr.hbm [resolvable:$true] %s63_s20 }
   0xb   :  { %s50_s0 = sshll.u32 %s634_s17, 4  ;;  %s635_s21 = smov [#allocation8]   ;;  %s51_s0 = int_to_ptr.vmem [resolvable:$true] %s50_s0 }
   0xc   :  { %56 = dma.hbm_to_vmem [thread:$0]  %s49_s16, 1024, %s51_s0, [#allocation6], %s629_s9, %s629_s9, %s630_s10  }
   0xd   :  { %s65_s22 = sshll.u32 %s635_s21, 4  ;;  %s66_s22 = int_to_ptr.vmem [resolvable:$true] %s65_s22 }
   0xe   :  { %71 = dma.hbm_to_vmem [thread:$0]  %s64_s20, 1024, %s66_s22, [#allocation9], %s629_s9, %s629_s9, %s630_s10  }
   0xf   :  { %620 = dma.done.wait [#allocation3], 256  }
  0x10   :  { %621 = vsyncadd [#allocation3], 4294967040 }
  0x11   :  { %622 = dma.done.wait [#allocation6], 2048  }
  0x12   :  { %623 = vsyncadd [#allocation6], 4294965248 }
  0x13   :  { %624 = dma.done.wait [#allocation9], 1024  }
  0x14   :  { %625 = vsyncadd [#allocation9], 4294966272  ;;  %v471_v0 = vld [vmem:[#allocation5 + $0x38] sm:$0xff]  ;;  %v470_v1 = vld [vmem:[#allocation5 + $0x30] sm:$0xff]  ;;  %s636_s26 = smov [#allocation10]  }
  0x15   :  { %161 = vmatpush.bf16.msra.mxu0 %v471_v0  ;;  %v479_v2 = vld [vmem:[#allocation7 + $0x38] sm:$0xff]  ;;  %v478_v3 = vld [vmem:[#allocation7 + $0x30] sm:$0xff]  ;;  %v469_v4 = vld [vmem:[#allocation5 + $0x28] sm:$0xff]  ;;  %s351_s27 = sshll.u32 %s636_s26, 4  ;;  %s352_s27 = int_to_ptr.vmem [resolvable:$true] %s351_s27 }
  0x16   :  { %246 = vmatpush.bf16.msra.mxu1 %v479_v2  ;;  %v477_v5 = vld [vmem:[#allocation7 + $0x28] sm:$0xff]  ;;  %v468_v6 = vld [vmem:[#allocation5 + $0x20] sm:$0xff]  ;;  %v467_v8 = vld [vmem:[#allocation5 + $0x18] sm:$0xff] }
  0x17   :  { %v476_v7 = vld [vmem:[#allocation7 + $0x20] sm:$0xff]  ;;  %v466_v9 = vld [vmem:[#allocation5 + $0x10] sm:$0xff]  ;;  %v465_v10 = vld [vmem:[#allocation5 + $0x8] sm:$0xff] }
  0x18   :  { %v464_v11 = vld [vmem:[#allocation5] sm:$0xff]  ;;  %v90_v12 = vld [vmem:[#allocation2] sm:$0xff]  ;;  %v91_v13 = vld [vmem:[#allocation2 + $0x8] sm:$0xff] }
  0x19   :  { %162 = vmatpush.bf16.msra.mxu0 %v470_v1  ;;  %v109_v14 = vpack.c.bf16 %v91_v13, %v90_v12  ;;  %v475_v15 = vld [vmem:[#allocation7 + $0x18] sm:$0xff]  ;;  %v474_v16 = vld [vmem:[#allocation7 + $0x10] sm:$0xff]  ;;  %v473_v17 = vld [vmem:[#allocation7 + $0x8] sm:$0xff] }
  0x1a   :  { %247 = vmatpush.bf16.msra.mxu1 %v478_v3  ;;  %v472_v18 = vld [vmem:[#allocation7] sm:$0xff]  ;;  %v487_v19 = vld [vmem:[#allocation8 + $0x38] sm:$0xff]  ;;  %v486_v20 = vld [vmem:[#allocation8 + $0x30] sm:$0xff] }
  0x1b   :  { %331 = vmatpush.bf16.msra.mxu2 %v487_v19  ;;  %v485_v21 = vld [vmem:[#allocation8 + $0x28] sm:$0xff]  ;;  %v484_v22 = vld [vmem:[#allocation8 + $0x20] sm:$0xff]  ;;  %v497_v24 = vld [vmem:[%s709_s2] ss:$0 sm:$0xff] }
  0x1c   :  { %v483_v31 = vld [vmem:[#allocation8 + $0x18] sm:$0xff]  ;;  %v482_v32 = vld [vmem:[#allocation8 + $0x10] sm:$0xff]  ;;  %v481_v33 = vld [vmem:[#allocation8 + $0x8] sm:$0xff] }
  0x1d   :  { %163 = vmatpush.bf16.msra.mxu0 %v469_v4  ;;  %v480_v34 = vld [vmem:[#allocation8] sm:$0xff]  ;;  %v498_v36 = vld [vmem:[%s711_s4] ss:$0 sm:$0xff]  ;;  %s353_s4 = sshll.u32 %s714_s7, 4  ;;  %s354_s4 = int_to_ptr.hbm [resolvable:$true] %s353_s4 }
  0x1e   :  { %248 = vmatpush.bf16.msra.mxu1 %v477_v5  ;;  %v499_v43 = vld [vmem:[%s713_s6] ss:$0 sm:$0xff] }
  0x1f   :  { %332 = vmatpush.bf16.msra.mxu2 %v486_v20 }
  0x21   :  { %164 = vmatpush.bf16.msra.mxu0 %v468_v6 }
  0x22   :  { %249 = vmatpush.bf16.msra.mxu1 %v476_v7 }
  0x23   :  { %333 = vmatpush.bf16.msra.mxu2 %v485_v21 }
  0x25   :  { %165 = vmatpush.bf16.msra.mxu0 %v467_v8 }
  0x26   :  { %250 = vmatpush.bf16.msra.mxu1 %v475_v15 }
  0x27   :  { %334 = vmatpush.bf16.msra.mxu2 %v484_v22 }
  0x29   :  { %166 = vmatpush.bf16.msra.mxu0 %v466_v9 }
  0x2a   :  { %251 = vmatpush.bf16.msra.mxu1 %v474_v16 }
  0x2b   :  { %335 = vmatpush.bf16.msra.mxu2 %v483_v31 }
  0x2d   :  { %167 = vmatpush.bf16.msra.mxu0 %v465_v10 }
  0x2e   :  { %252 = vmatpush.bf16.msra.mxu1 %v473_v17 }
  0x2f   :  { %336 = vmatpush.bf16.msra.mxu2 %v482_v32 }
  0x31   :  { %168 = vmatpush.bf16.msra.mxu0 %v464_v11 }
  0x32   :  { %253 = vmatpush.bf16.msra.mxu1 %v472_v18 }
  0x33   :  { %337 = vmatpush.bf16.msra.mxu2 %v481_v33 }
  0x34   :  { %169 = vmatmul.bf16.vlgmr.msra.gmra.mxu0 %v109_v14 }
  0x37   :  { %338 = vmatpush.bf16.msra.mxu2 %v480_v34 }
  0xb1   :  { %v170_v23 = vpop.f32.mrf.mxu0 }
  0xb2   :  { %v171_v25 = vadd.f32 %v497_v24, %v170_v23 }
  0xb4   :  { %v175_v28 = vmax.f32 %v171_v25, 0.0 }
  0xb9   :  { %v172_v26 = vpop.f32.mrf.mxu0 }
  0xba   :  { %v173_v27 = vadd.f32 %v497_v24, %v172_v26 }
  0xbc   :  { %v176_v29 = vmax.f32 %v173_v27, 0.0 }
  0xbe   :  { %v194_v30 = vpack.c.bf16 %v176_v29, %v175_v28 }
  0xc0   :  { %254 = vmatmul.bf16.vlgmr.msra.gmra.mxu1 %v194_v30 }
 0x13d   :  { %v255_v35 = vpop.f32.mrf.mxu1 }
 0x13e   :  { %v256_v37 = vadd.f32 %v498_v36, %v255_v35 }
 0x140   :  { %v260_v40 = vmax.f32 %v256_v37, 0.0 }
 0x145   :  { %v257_v38 = vpop.f32.mrf.mxu1 }
 0x146   :  { %v258_v39 = vadd.f32 %v498_v36, %v257_v38 }
 0x148   :  { %v261_v41 = vmax.f32 %v258_v39, 0.0 }
 0x14a   :  { %v279_v42 = vpack.c.bf16 %v261_v41, %v260_v40 }
 0x14c   :  { %339 = vmatmul.bf16.vlgmr.msra.gmra.mxu2 %v279_v42 }
 0x1cf   :  { %v340_v44 = vpop.f32.mrf.mxu2 }
 0x1d0   :  { %v341_v45 = vadd.f32 %v499_v43, %v340_v44 }
 0x1d2   :  { %345 = vst [vmem:[#allocation10] sm:$0xff] %v341_v45 }
 0x1d7   :  { %v342_v46 = vpop.f32.mrf.mxu2 }
 0x1d8   :  { %v343_v47 = vadd.f32 %v499_v43, %v342_v46 }
 0x1da   :  { %346 = vst [vmem:[#allocation10 + $0x8] sm:$0xff] %v343_v47 }
 0x1db   :  { %359 = dma.vmem_to_hbm [thread:$0]  %s352_s27, 256, %s354_s4, [#allocation4], %s632_s13, %s632_s13, %s633_s14  }
 0x1dc   :  { %626 = dma.done.wait [#allocation4], 256  }
 0x1dd   :  { %627 = vsyncadd [#allocation4], 4294967040 }
 0x1de   :  { %364 = vsyncpa [#allocation3], 1 }
 0x1df   :  { %365 = vsyncpa [#allocation6], 1 }
 0x1e0   :  { %366 = vsyncpa [#allocation9], 1 }
 0x1e1   :  { %367 = vsyncpa [#allocation4], 1 }

</bundles_post_ra>
